<compile_context>
chip_gen: v7x
topology: tpu7x:2x2x1
jax: 0.10.0
libtpu: 0.0.40
codegen_flags: <defaults>
</compile_context>

<pallas_src>
from functools import partial

import jax
import jax.numpy as jnp
from jax.experimental import pallas as pl
from jax.experimental.pallas import tpu as pltpu

LANE = 128
SUBLANE = 8
MAX_TILE_B = 1024


def _round_up(v, m):
    return (v + m - 1) // m * m


def _num_tensorcores_per_chip():
    """2 TCs/chip on v7x, 1 on v5e/v6e.  Purely a trace-time Python constant."""
    try:
        kind = jax.devices()[0].device_kind.lower()
    except Exception:
        return 1
    return 2 if ("v7" in kind or "tpu7" in kind) else 1


_NUM_TC = _num_tensorcores_per_chip()


def dqn_kernel(x_ref, w1_ref, b1_ref, w2_ref, b2_ref, w3_ref, b3_ref, o_ref):
    # Cast x to bf16 in-kernel (VPU, free under the MXU/DMA); accumulate in f32.
    xb = x_ref[...].astype(jnp.bfloat16)
    # fc1 + ReLU
    h1 = jnp.dot(xb, w1_ref[...], preferred_element_type=jnp.float32) + b1_ref[...]
    h1 = jnp.maximum(h1, 0.0).astype(jnp.bfloat16)
    # fc2 + ReLU
    h2 = jnp.dot(h1, w2_ref[...], preferred_element_type=jnp.float32) + b2_ref[...]
    h2 = jnp.maximum(h2, 0.0).astype(jnp.bfloat16)
    # fc3 (no activation).  Lane-padded to 128 output columns; stored bf16 to
    # halve HBM writeback; wrapper slices back to action_dim.
    h3 = jnp.dot(h2, w3_ref[...], preferred_element_type=jnp.float32) + b3_ref[...]
    o_ref[...] = h3.astype(o_ref.dtype)


def prepare_params(w1, b1, w2, b2, w3, b3):
    """One-time parameter prep: bf16 casts + fc3 lane-padding (cacheable)."""
    hidden_dim = w1.shape[1]
    action_dim = w3.shape[1]
    n_out = _round_up(action_dim, LANE)

    w1b = w1.astype(jnp.bfloat16)
    w2b = w2.astype(jnp.bfloat16)
    w3p = jnp.zeros((hidden_dim, n_out), jnp.bfloat16)
    w3p = w3p.at[:, :action_dim].set(w3.astype(jnp.bfloat16))
    b1f = b1.astype(jnp.float32)
    b2f = b2.astype(jnp.float32)
    b3p = jnp.zeros((1, n_out), jnp.float32).at[:, :action_dim].set(b3)
    return (w1b, b1f, w2b, b2f, w3p, b3p), action_dim


@partial(jax.jit, static_argnames=("action_dim",))
def dqn_forward(x, w1b, b1, w2b, b2, w3p, b3p, *, action_dim):
    batch, state_dim = x.shape
    hidden_dim = w1b.shape[1]
    n_out = w3p.shape[1]

    # ---- static tiling decisions (all shapes concrete at trace time) ----
    tile_b = min(MAX_TILE_B, _round_up(batch, SUBLANE))
    if _NUM_TC > 1 and batch > SUBLANE and tile_b >= batch:
        # v7x: guarantee grid_b >= 2 so the "parallel" batch axis splits across
        # both TensorCores instead of leaving one idle.
        tile_b = min(tile_b, _round_up(pl.cdiv(batch, 2), SUBLANE))
    grid_b = pl.cdiv(batch, tile_b)

    flops = 2 * batch * (state_dim * hidden_dim
                         + hidden_dim * hidden_dim
                         + hidden_dim * n_out)
    bytes_accessed = (x.size * 4
                      + w1b.size * 2 + w2b.size * 2 + w3p.size * 2
                      + b1.size * 4 + b2.size * 4 + b3p.size * 4
                      + batch * n_out * 2)

    resident = lambda i: (0, 0)  # weights/biases: same block every grid step
    out_padded = pl.pallas_call(
        dqn_kernel,
        out_shape=jax.ShapeDtypeStruct((batch, n_out), jnp.bfloat16),
        grid=(grid_b,),
        in_specs=[
            pl.BlockSpec((tile_b, state_dim), lambda i: (i, 0)),   # x: streamed
            pl.BlockSpec((state_dim, hidden_dim), resident),       # w1
            pl.BlockSpec((1, hidden_dim), resident),               # b1
            pl.BlockSpec((hidden_dim, hidden_dim), resident),      # w2
            pl.BlockSpec((1, hidden_dim), resident),               # b2
            pl.BlockSpec((hidden_dim, n_out), resident),           # w3 (padded)
            pl.BlockSpec((1, n_out), resident),                    # b3 (padded)
        ],
        out_specs=pl.BlockSpec((tile_b, n_out), lambda i: (i, 0)),
        compiler_params=pltpu.CompilerParams(
            dimension_semantics=("parallel",)),
        cost_estimate=pl.CostEstimate(
            flops=flops, transcendentals=0, bytes_accessed=bytes_accessed),
    )(x, w1b, b1, w2b, b2, w3p, b3p)

    # TODO(synk): for heavy training batches, pack 32 rows x 4 actions per
    # 128-lane output row to remove the remaining lane padding entirely.
    return out_padded[:, :action_dim]


def init_linear_params(key, in_features, out_features):
    """Deterministic PyTorch-style nn.Linear init (uniform +/- 1/sqrt(in))."""
    k_w, k_b = jax.random.split(key)
    bound = 1.0 / jnp.sqrt(jnp.float32(in_features))
    # stored as (in, out) so the kernel does x @ W
    w = jax.random.uniform(k_w, (in_features, out_features), jnp.float32, -bound, bound)
    b = jax.random.uniform(k_b, (1, out_features), jnp.float32, -bound, bound)
    return w, b


def reference_forward(x, w1, b1, w2, b2, w3, b3):
    # Same bf16 operand / f32 accumulation recipe as the kernel.
    xb = x.astype(jnp.bfloat16)
    h1 = jnp.dot(xb, w1.astype(jnp.bfloat16), preferred_element_type=jnp.float32) + b1
    h1 = jnp.maximum(h1, 0.0).astype(jnp.bfloat16)
    h2 = jnp.dot(h1, w2.astype(jnp.bfloat16), preferred_element_type=jnp.float32) + b2
    h2 = jnp.maximum(h2, 0.0).astype(jnp.bfloat16)
    return jnp.dot(h2, w3.astype(jnp.bfloat16), preferred_element_type=jnp.float32) + b3


if __name__ == "__main__":
    # Small shapes consistent with the DQN module (snake: small state / few actions).
    batch = 8
    state_dim = 16
    hidden_dim = 128
    action_dim = 4

    key = jax.random.PRNGKey(0)
    k_x, k1, k2, k3 = jax.random.split(key, 4)

    x = jax.random.normal(k_x, (batch, state_dim), jnp.float32)
    w1, b1 = init_linear_params(k1, state_dim, hidden_dim)
    w2, b2 = init_linear_params(k2, hidden_dim, hidden_dim)
    w3, b3 = init_linear_params(k3, hidden_dim, action_dim)

    (w1b, b1f, w2b, b2f, w3p, b3p), act_dim = prepare_params(w1, b1, w2, b2, w3, b3)

    out = dqn_forward(x, w1b, b1f, w2b, b2f, w3p, b3p, action_dim=act_dim)
    out = jax.block_until_ready(out)

    ref = reference_forward(x, w1, b1, w2, b2, w3, b3)
    assert out.shape == (batch, action_dim)
    assert jnp.allclose(out.astype(jnp.float32), ref, atol=1.5e-2, rtol=1.5e-2), \
        "mismatch vs JAX reference"

    print("KERNEL_OK")
</pallas_src>

<mosaic_0001>
module attributes {stable_mosaic.version = 11 : i64} {
  func.func @dqn_kernel(%arg0: i32, %arg1: memref<8x16xf32, #tpu.memory_space<vmem>>, %arg2: memref<16x128xbf16, #tpu.memory_space<vmem>>, %arg3: memref<1x128xf32, #tpu.memory_space<vmem>>, %arg4: memref<128x128xbf16, #tpu.memory_space<vmem>>, %arg5: memref<1x128xf32, #tpu.memory_space<vmem>>, %arg6: memref<128x128xbf16, #tpu.memory_space<vmem>>, %arg7: memref<1x128xf32, #tpu.memory_space<vmem>>, %arg8: memref<8x128xbf16, #tpu.memory_space<vmem>>) attributes {dimension_semantics = [#tpu.dimension_semantics<parallel>], iteration_bounds = array<i64: 1>, scalar_prefetch = 0 : i64, scratch_operands = 0 : i64, tpu.core_type = #tpu.core_type<tc>, window_params = [{transform_indices = @transform_0, window_bounds = array<i64: 8, 16>}, {pipeline_mode = #tpu.pipeline_mode<synchronous>, transform_indices = @transform_1, window_bounds = array<i64: 16, 128>}, {pipeline_mode = #tpu.pipeline_mode<synchronous>, transform_indices = @transform_2, window_bounds = array<i64: 1, 128>}, {pipeline_mode = #tpu.pipeline_mode<synchronous>, transform_indices = @transform_3, window_bounds = array<i64: 128, 128>}, {pipeline_mode = #tpu.pipeline_mode<synchronous>, transform_indices = @transform_4, window_bounds = array<i64: 1, 128>}, {pipeline_mode = #tpu.pipeline_mode<synchronous>, transform_indices = @transform_5, window_bounds = array<i64: 128, 128>}, {pipeline_mode = #tpu.pipeline_mode<synchronous>, transform_indices = @transform_6, window_bounds = array<i64: 1, 128>}, {transform_indices = @transform_7, window_bounds = array<i64: 8, 128>}]} {
    %c0 = arith.constant 0 : index
    %c0_0 = arith.constant 0 : index
    %0 = vector.load %arg1[%c0, %c0_0] : memref<8x16xf32, #tpu.memory_space<vmem>>, vector<8x16xf32>
    %1 = arith.truncf %0 : vector<8x16xf32> to vector<8x16xbf16>
    %c0_1 = arith.constant 0 : index
    %c0_2 = arith.constant 0 : index
    %2 = vector.load %arg2[%c0_1, %c0_2] : memref<16x128xbf16, #tpu.memory_space<vmem>>, vector<16x128xbf16>
    %cst = arith.constant dense<0.000000e+00> : vector<8x128xf32>
    %3 = tpu.matmul %1, %2, %cst {dimension_numbers = #tpu.dot_dimension_numbers<[1], [0], [0], [1], [0, 0, 1, 1], [], []>} : vector<8x16xbf16>, vector<16x128xbf16>, vector<8x128xf32> -> vector<8x128xf32>
    %c0_3 = arith.constant 0 : index
    %c0_4 = arith.constant 0 : index
    %4 = vector.load %arg3[%c0_3, %c0_4] : memref<1x128xf32, #tpu.memory_space<vmem>>, vector<1x128xf32>
    %5 = vector.broadcast %4 : vector<1x128xf32> to vector<8x128xf32>
    %6 = arith.addf %3, %5 : vector<8x128xf32>
    %cst_5 = arith.constant 0.000000e+00 : f32
    %7 = vector.broadcast %cst_5 : f32 to vector<8x128xf32>
    %8 = arith.maximumf %6, %7 : vector<8x128xf32>
    %9 = arith.truncf %8 : vector<8x128xf32> to vector<8x128xbf16>
    %c0_6 = arith.constant 0 : index
    %c0_7 = arith.constant 0 : index
    %10 = vector.load %arg4[%c0_6, %c0_7] : memref<128x128xbf16, #tpu.memory_space<vmem>>, vector<128x128xbf16>
    %cst_8 = arith.constant dense<0.000000e+00> : vector<8x128xf32>
    %11 = tpu.matmul %9, %10, %cst_8 {dimension_numbers = #tpu.dot_dimension_numbers<[1], [0], [0], [1], [0, 0, 1, 1], [], []>} : vector<8x128xbf16>, vector<128x128xbf16>, vector<8x128xf32> -> vector<8x128xf32>
    %c0_9 = arith.constant 0 : index
    %c0_10 = arith.constant 0 : index
    %12 = vector.load %arg5[%c0_9, %c0_10] : memref<1x128xf32, #tpu.memory_space<vmem>>, vector<1x128xf32>
    %13 = vector.broadcast %12 : vector<1x128xf32> to vector<8x128xf32>
    %14 = arith.addf %11, %13 : vector<8x128xf32>
    %cst_11 = arith.constant 0.000000e+00 : f32
    %15 = vector.broadcast %cst_11 : f32 to vector<8x128xf32>
    %16 = arith.maximumf %14, %15 : vector<8x128xf32>
    %17 = arith.truncf %16 : vector<8x128xf32> to vector<8x128xbf16>
    %c0_12 = arith.constant 0 : index
    %c0_13 = arith.constant 0 : index
    %18 = vector.load %arg6[%c0_12, %c0_13] : memref<128x128xbf16, #tpu.memory_space<vmem>>, vector<128x128xbf16>
    %cst_14 = arith.constant dense<0.000000e+00> : vector<8x128xf32>
    %19 = tpu.matmul %17, %18, %cst_14 {dimension_numbers = #tpu.dot_dimension_numbers<[1], [0], [0], [1], [0, 0, 1, 1], [], []>} : vector<8x128xbf16>, vector<128x128xbf16>, vector<8x128xf32> -> vector<8x128xf32>
    %c0_15 = arith.constant 0 : index
    %c0_16 = arith.constant 0 : index
    %20 = vector.load %arg7[%c0_15, %c0_16] : memref<1x128xf32, #tpu.memory_space<vmem>>, vector<1x128xf32>
    %21 = vector.broadcast %20 : vector<1x128xf32> to vector<8x128xf32>
    %22 = arith.addf %19, %21 : vector<8x128xf32>
    %23 = arith.truncf %22 : vector<8x128xf32> to vector<8x128xbf16>
    %c0_17 = arith.constant 0 : index
    %c0_18 = arith.constant 0 : index
    %24 = vector.load %arg8[%c0_17, %c0_18] : memref<8x128xbf16, #tpu.memory_space<vmem>>, vector<8x128xbf16>
    tpu.vector_store %arg8[%c0_17, %c0_18], %23 {strides = array<i32>} : memref<8x128xbf16, #tpu.memory_space<vmem>>, vector<8x128xbf16>,
    return
  }
  func.func @transform_0(%arg0: i32) -> (i32, i32) {
    %c0_i32 = arith.constant 0 : i32
    %c0_i32_0 = arith.constant 0 : i32
    return %arg0, %c0_i32 : i32, i32
  }
  func.func @transform_1(%arg0: i32) -> (i32, i32) {
    %c0_i32 = arith.constant 0 : i32
    %c0_i32_0 = arith.constant 0 : i32
    %c0_i32_1 = arith.constant 0 : i32
    return %c0_i32, %c0_i32_0 : i32, i32
  }
  func.func @transform_2(%arg0: i32) -> (i32, i32) {
    %c0_i32 = arith.constant 0 : i32
    %c0_i32_0 = arith.constant 0 : i32
    %c0_i32_1 = arith.constant 0 : i32
    return %c0_i32, %c0_i32_0 : i32, i32
  }
  func.func @transform_3(%arg0: i32) -> (i32, i32) {
    %c0_i32 = arith.constant 0 : i32
    %c0_i32_0 = arith.constant 0 : i32
    %c0_i32_1 = arith.constant 0 : i32
    return %c0_i32, %c0_i32_0 : i32, i32
  }
  func.func @transform_4(%arg0: i32) -> (i32, i32) {
    %c0_i32 = arith.constant 0 : i32
    %c0_i32_0 = arith.constant 0 : i32
    %c0_i32_1 = arith.constant 0 : i32
    return %c0_i32, %c0_i32_0 : i32, i32
  }
  func.func @transform_5(%arg0: i32) -> (i32, i32) {
    %c0_i32 = arith.constant 0 : i32
    %c0_i32_0 = arith.constant 0 : i32
    %c0_i32_1 = arith.constant 0 : i32
    return %c0_i32, %c0_i32_0 : i32, i32
  }
  func.func @transform_6(%arg0: i32) -> (i32, i32) {
    %c0_i32 = arith.constant 0 : i32
    %c0_i32_0 = arith.constant 0 : i32
    %c0_i32_1 = arith.constant 0 : i32
    return %c0_i32, %c0_i32_0 : i32, i32
  }
  func.func @transform_7(%arg0: i32) -> (i32, i32) {
    %c0_i32 = arith.constant 0 : i32
    %c0_i32_0 = arith.constant 0 : i32
    return %arg0, %c0_i32 : i32, i32
  }
}

</mosaic_0001>

<bundles_post_ra>
// kernel: dqn_forward.1
= control target key start
LH: loop header
LB: loop body
LE: loop exit
PB: predicated region body
PF: predicated region fallthrough
CT: control target
= control target key end

     0   :  { %12 = vsyncpa [#allocation3], 0  ;;  %s719_s0 = inlined_call_operand.hbm [shape: f32[8,16], index: 0, kind: input, shape index: {}]   ;;  %s720_s1 = inlined_call_operand.hbm [shape: bf16[16,128], index: 1, kind: input, shape index: {}]   ;;  %s721_s2 = inlined_call_operand.vmem [shape: f32[1,128], index: 2, kind: input, shape index: {}]   ;;  %s722_s3 = inlined_call_operand.hbm [shape: bf16[128,128], index: 3, kind: input, shape index: {}]   ;;  %s723_s4 = inlined_call_operand.vmem [shape: f32[1,128], index: 4, kind: input, shape index: {}]   ;;  %s724_s5 = inlined_call_operand.hbm [shape: bf16[128,128], index: 5, kind: input, shape index: {}]   ;;  %s725_s6 = inlined_call_operand.vmem [shape: f32[1,128], index: 6, kind: input, shape index: {}]   ;;  %s726_s7 = inlined_call_operand.vmem [shape: bf16[8,128], index: 7, kind: output, shape index: {}]  }
   0x1   :  { %13 = vsyncpa [#allocation5], 0 }
   0x2   :  { %14 = vsyncpa [#allocation8], 0  ;;  %s582_s24 = smov [#allocation4]   ;;  %s488_s28 = scalar_lea.hbm %s720_s1, 128 }
   0x3   :  { %s30_s25 = sshll.u32 %s582_s24, 4  ;;  %p489_p0 = scmp.ne.s32.totalorder %s720_s1, %s488_s28  ;;  %s31_s25 = int_to_ptr.vmem [resolvable:$true] %s30_s25 }
   0x4   :  { %p492_p1 = scmp.lt.u32.totalorder %s488_s28, %s720_s1 }
   0x6   :  { %p494_p2 = pnand %p492_p1, %p489_p0 }
   0x8   :  { %497 = shalt.err (!%p494_p2)
}
   0x9   :  { %s498_s10 = scalar_lea.vmem %s31_s25, 128  ;;  %p503_p4 = scmp.lt.s32.totalorder %s31_s25, %s31_s25 }
   0xa   :  { %p499_p3 = scmp.ne.s32.totalorder %s31_s25, %s498_s10  ;;  %p504_p5 = scmp.lt.s32.totalorder %s498_s10, %s498_s10 }
   0xc   :  { %p505_p6 = por %p504_p5, %p503_p4 }
   0xe   :  { %p506_p7 = pnand %p505_p6, %p499_p3 }
  0x10   :  { %509 = shalt.err (!%p506_p7)
}
  0x11   :  { %s583_s11 = smov 64   ;;  %s584_s12 = smov 4  }
  0x12   :  { %36 = dma.hbm_to_vmem [thread:$0]  %s720_s1, 128, %s31_s25, [#allocation5], %s583_s11, %s583_s11, %s584_s12  }
  0x13   :  { %s585_s15 = smov [#allocation2]   ;;  %s586_s17 = smov [#allocation6]  }
  0x14   :  { %s21_s16 = sshll.u32 %s585_s15, 4  ;;  %s44_s18 = sshll.u32 %s586_s17, 4  ;;  %s22_s16 = int_to_ptr.vmem [resolvable:$true] %s21_s16  ;;  %s45_s18 = int_to_ptr.vmem [resolvable:$true] %s44_s18 }
  0x15   :  { %s510_s21 = scalar_lea.hbm %s719_s0, 128 }
  0x16   :  { %p511_p8 = scmp.ne.s32.totalorder %s719_s0, %s510_s21  ;;  %p514_p9 = scmp.lt.u32.totalorder %s510_s21, %s719_s0 }
  0x18   :  { %p516_p10 = pnand %p514_p9, %p511_p8 }
  0x1a   :  { %519 = shalt.err (!%p516_p10)
}
  0x1b   :  { %s520_s1 = scalar_lea.vmem %s22_s16, 128  ;;  %p525_p12 = scmp.lt.s32.totalorder %s22_s16, %s22_s16 }
  0x1c   :  { %p521_p11 = scmp.ne.s32.totalorder %s22_s16, %s520_s1  ;;  %p526_p13 = scmp.lt.s32.totalorder %s520_s1, %s520_s1 }
  0x1e   :  { %p527_p0 = por %p526_p13, %p525_p12 }
  0x20   :  { %p528_p1 = pnand %p527_p0, %p521_p11 }
  0x22   :  { %531 = shalt.err (!%p528_p1)
}
  0x23   :  { %24 = dma.hbm_to_vmem [thread:$0]  %s719_s0, 128, %s22_s16, [#allocation3]  }
  0x24   :  { %s532_s30 = scalar_lea.hbm %s722_s3, 1024 }
  0x25   :  { %p533_p2 = scmp.ne.s32.totalorder %s722_s3, %s532_s30  ;;  %p536_p3 = scmp.lt.u32.totalorder %s532_s30, %s722_s3 }
  0x27   :  { %p538_p4 = pnand %p536_p3, %p533_p2 }
  0x29   :  { %541 = shalt.err (!%p538_p4)
}
  0x2a   :  { %s542_s14 = scalar_lea.vmem %s45_s18, 1024  ;;  %p547_p6 = scmp.lt.s32.totalorder %s45_s18, %s45_s18 }
  0x2b   :  { %p543_p5 = scmp.ne.s32.totalorder %s45_s18, %s542_s14  ;;  %p548_p7 = scmp.lt.s32.totalorder %s542_s14, %s542_s14 }
  0x2d   :  { %p549_p8 = por %p548_p7, %p547_p6 }
  0x2f   :  { %p550_p9 = pnand %p549_p8, %p543_p5 }
  0x31   :  { %553 = shalt.err (!%p550_p9)
}
  0x32   :  { %50 = dma.hbm_to_vmem [thread:$0]  %s722_s3, 1024, %s45_s18, [#allocation5], %s583_s11, %s583_s11, %s584_s12  }
  0x33   :  { %s587_s16 = smov [#allocation7]   ;;  %s554_s21 = scalar_lea.hbm %s724_s5, 1024 }
  0x34   :  { %s58_s17 = sshll.u32 %s587_s16, 4  ;;  %p555_p10 = scmp.ne.s32.totalorder %s724_s5, %s554_s21  ;;  %s59_s17 = int_to_ptr.vmem [resolvable:$true] %s58_s17 }
  0x35   :  { %p558_p11 = scmp.lt.u32.totalorder %s554_s21, %s724_s5 }
  0x37   :  { %p560_p12 = pnand %p558_p11, %p555_p10 }
  0x39   :  { %563 = shalt.err (!%p560_p12)
}
  0x3a   :  { %s564_s1 = scalar_lea.vmem %s59_s17, 1024  ;;  %p569_p0 = scmp.lt.s32.totalorder %s59_s17, %s59_s17 }
  0x3b   :  { %p565_p13 = scmp.ne.s32.totalorder %s59_s17, %s564_s1  ;;  %p570_p1 = scmp.lt.s32.totalorder %s564_s1, %s564_s1 }
  0x3d   :  { %p571_p2 = por %p570_p1, %p569_p0 }
  0x3f   :  { %p572_p3 = pnand %p571_p2, %p565_p13 }
  0x41   :  { %575 = shalt.err (!%p572_p3)
}
  0x42   :  { %64 = dma.hbm_to_vmem [thread:$0]  %s724_s5, 1024, %s59_s17, [#allocation8], %s583_s11, %s583_s11, %s584_s12  }
  0x43   :  { %576 = dma.done.wait [#allocation3], 128  }
  0x44   :  { %577 = vsyncadd [#allocation3], 4294967168 }
  0x45   :  { %578 = dma.done.wait [#allocation5], 1152  }
  0x46   :  { %579 = vsyncadd [#allocation5], 4294966144 }
  0x47   :  { %580 = dma.done.wait [#allocation8], 1024  }
  0x48   :  { %581 = vsyncadd [#allocation8], 4294966272  ;;  %v588_v0 = vmov 0.0   ;;  %vm589_vm0 = vmmov 0   ;;  %v471_v1 = vld [vmem:[#allocation4] sm:$0xff]   ;;  %v80_v2 = vld [vmem:[#allocation2] sm:$0xff] }
  0x49   :  { %417 = vmatprep.subr.bf16.mxu0 %v588_v0  ;;  %419 = vmatprep.mubr.msk.bf16.mxu0 %vm589_vm0, %v588_v0  ;;  %v81_v3 = vpack.c.bf16 %v80_v2, %v80_v2  ;;  %vm97_vm1 = vcmask 130048   ;;  %v472_v4 = vld [vmem:[#allocation6] sm:$0xff]   ;;  %v473_v5 = vld [vmem:[#allocation6 + $0x8] sm:$0xff]   ;;  %v474_v6 = vld [vmem:[#allocation6 + $0x10] sm:$0xff]  }
  0x4a   :  { %423 = vmatprep.subr.bf16.mxu1 %v588_v0  ;;  %439 = vmatprep.mubr.msk.bf16.mxu1 %vm589_vm0, %v588_v0  ;;  %v475_v7 = vld [vmem:[#allocation6 + $0x18] sm:$0xff]   ;;  %v476_v8 = vld [vmem:[#allocation6 + $0x20] sm:$0xff]   ;;  %v477_v9 = vld [vmem:[#allocation6 + $0x28] sm:$0xff]  }
  0x4b   :  { %418 = vmatpush3.bf16.msra.mxu0 %v471_v1  ;;  %424 = vmatpush3.bf16.msra.mxu1 %v472_v4  ;;  %v478_v10 = vld [vmem:[#allocation6 + $0x30] sm:$0xff]   ;;  %v479_v11 = vld [vmem:[#allocation6 + $0x38] sm:$0xff]   ;;  %v480_v12 = vld [vmem:[#allocation7] sm:$0xff]  }
  0x4c   :  { %443 = vmatprep.subr.bf16.mxu0 %v588_v0  ;;  %425 = vmatprep.subr.bf16.mxu1 %v588_v0  ;;  %v481_v13 = vld [vmem:[#allocation7 + $0x8] sm:$0xff]   ;;  %v482_v14 = vld [vmem:[#allocation7 + $0x10] sm:$0xff]   ;;  %v483_v15 = vld [vmem:[#allocation7 + $0x18] sm:$0xff]  }
  0x4d   :  { %v484_v16 = vld [vmem:[#allocation7 + $0x20] sm:$0xff]   ;;  %v485_v17 = vld [vmem:[#allocation7 + $0x28] sm:$0xff]   ;;  %v376_v18 = vld [vmem:[%s721_s2] ss:$0 sm:$0xff] }
  0x4e   :  { %420 = vmatmul.mubr.msk.bf16.vlgmr.msra.gmra.mrb[0].mxu0 %vm97_vm1, %v81_v3  ;;  %v486_v26 = vld [vmem:[#allocation7 + $0x30] sm:$0xff]   ;;  %v487_v27 = vld [vmem:[#allocation7 + $0x38] sm:$0xff]  }
  0x4f   :  { %459 = vmatprep.mubr.msk.bf16.mxu0 %vm589_vm0, %v588_v0  ;;  %426 = vmatpush3.bf16.msra.mxu1 %v473_v5  ;;  %v379_v28 = vld [vmem:[%s723_s4] ss:$0 sm:$0xff] }
  0x50   :  { %427 = vmatprep.subr.bf16.mxu1 %v588_v0  ;;  %444 = vmatpush3.bf16.msra.mxu0 %v480_v12  ;;  %v388_v36 = vld [vmem:[%s725_s6] ss:$0 sm:$0xff] }
  0x51   :  { %445 = vmatprep.subr.bf16.mxu0 %v588_v0 }
  0x53   :  { %428 = vmatpush3.bf16.msra.mxu1 %v474_v6 }
  0x54   :  { %429 = vmatprep.subr.bf16.mxu1 %v588_v0  ;;  %446 = vmatpush3.bf16.msra.mxu0 %v481_v13 }
  0x55   :  { %447 = vmatprep.subr.bf16.mxu0 %v588_v0 }
  0x57   :  { %430 = vmatpush3.bf16.msra.mxu1 %v475_v7 }
  0x58   :  { %431 = vmatprep.subr.bf16.mxu1 %v588_v0  ;;  %448 = vmatpush3.bf16.msra.mxu0 %v482_v14 }
  0x59   :  { %449 = vmatprep.subr.bf16.mxu0 %v588_v0 }
  0x5b   :  { %432 = vmatpush3.bf16.msra.mxu1 %v476_v8 }
  0x5c   :  { %433 = vmatprep.subr.bf16.mxu1 %v588_v0  ;;  %450 = vmatpush3.bf16.msra.mxu0 %v483_v15 }
  0x5d   :  { %451 = vmatprep.subr.bf16.mxu0 %v588_v0 }
  0x5f   :  { %434 = vmatpush3.bf16.msra.mxu1 %v477_v9 }
  0x60   :  { %435 = vmatprep.subr.bf16.mxu1 %v588_v0  ;;  %452 = vmatpush3.bf16.msra.mxu0 %v484_v16 }
  0x61   :  { %453 = vmatprep.subr.bf16.mxu0 %v588_v0 }
  0x63   :  { %436 = vmatpush3.bf16.msra.mxu1 %v478_v10 }
  0x64   :  { %437 = vmatprep.subr.bf16.mxu1 %v588_v0  ;;  %454 = vmatpush3.bf16.msra.mxu0 %v485_v17 }
  0x65   :  { %455 = vmatprep.subr.bf16.mxu0 %v588_v0 }
  0x67   :  { %438 = vmatpush3.bf16.msra.mxu1 %v479_v11 }
  0x68   :  { %456 = vmatpush3.bf16.msra.mxu0 %v486_v26 }
  0x69   :  { %457 = vmatprep.subr.bf16.mxu0 %v588_v0 }
  0x6c   :  { %458 = vmatpush3.bf16.msra.mxu0 %v487_v27 }
 0x121   :  { %v135_v19 = vpop.f32.mrb[0].mxu0 }
 0x122   :  { %v136_v20 = vadd.f32 %v376_v18, %v135_v19  ;;  %v421_v21 = vpop.f32.mrb[1].mxu0 }
 0x123   :  { %v138_v22 = vpop.f32.mrb[2].mxu0 }
 0x124   :  { %v141_v23 = vmax.f32 %v136_v20, 0.0  ;;  %v422_v24 = vpop.f32.mrb[3].mxu0 }
 0x126   :  { %v142_v25 = vpack.c.bf16 %v141_v23, %v141_v23 }
 0x128   :  { %440 = vmatmul.mubr.bf16.vlgmr.msra.gmra.mrb[0].mxu1 %v142_v25 }
 0x1fb   :  { %v248_v29 = vpop.f32.mrb[0].mxu1 }
 0x1fc   :  { %v249_v30 = vadd.f32 %v379_v28, %v248_v29  ;;  %v441_v31 = vpop.f32.mrb[1].mxu1 }
 0x1fd   :  { %v251_v32 = vpop.f32.mrb[2].mxu1 }
 0x1fe   :  { %v254_v33 = vmax.f32 %v249_v30, 0.0  ;;  %v442_v34 = vpop.f32.mrb[3].mxu1 }
 0x200   :  { %v255_v35 = vpack.c.bf16 %v254_v33, %v254_v33 }
 0x202   :  { %460 = vmatmul.mubr.bf16.vlgmr.msra.gmra.mrb[4].mxu0 %v255_v35 }
 0x2d5   :  { %v361_v37 = vpop.f32.mrb[4].mxu0 }
 0x2d6   :  { %v362_v38 = vadd.f32 %v388_v36, %v361_v37  ;;  %v461_v39 = vpop.f32.mrb[5].mxu0 }
 0x2d7   :  { %v364_v40 = vpop.f32.mrb[6].mxu0 }
 0x2d8   :  { %v367_v41 = vpack.c.bf16 %v362_v38, %v362_v38  ;;  %v462_v42 = vpop.f32.mrb[7].mxu0 }
 0x2da   :  { %368 = vst [vmem:[%s726_s7] sm:$0xf] %v367_v41 }
 0x2db   :  { %373 = vsyncpa [#allocation3], 1 }
 0x2dc   :  { %374 = vsyncpa [#allocation5], 1 }
 0x2dd   :  { %375 = vsyncpa [#allocation8], 1 }

</bundles_post_ra>
